<compile_context>
chip_gen: v7x
topology: tpu7x:2x2x1
jax: 0.10.0
libtpu: 0.0.40
codegen_flags: <defaults>
</compile_context>

<pallas_src>
import functools

import numpy as np

import jax
import jax.numpy as jnp
from jax import lax
from jax.experimental import pallas as pl
from jax.experimental.pallas import tpu as pltpu


# ----------------------------- fused Pallas kernel ---------------------------

def basic_block_kernel(x_ref, mask_ref, w1_ref, s1_ref, b1_ref,
                       w2_ref, s2_ref, b2_ref, o_ref, xex, patches, *, width):
    # x_ref    : (1, C, H*W)   f32, one batch element, spatial on lanes
    # mask_ref : (9, H*W)      bf16, per-tap 'same'-padding validity mask (0/1)
    # w1_ref   : (C, 9*C)      bf16, conv1 weights in im2col layout
    # s1_ref   : (C, 1)        f32, folded BN1 scale
    # b1_ref   : (C, 1)        f32, folded BN1 shift
    # w2_ref   : (C, 9*C)      bf16, conv2 weights in im2col layout
    # s2_ref   : (C, 1)        f32, folded BN2 scale
    # b2_ref   : (C, 1)        f32, folded BN2 shift
    # o_ref    : (1, C, H*W)
    # xex      : VMEM (C, H*W + 2*W + 2) f32   zero-extended activation
    # patches  : VMEM (9*C, H*W)        bf16   im2col patch matrix (shared)
    C, HW = o_ref.shape[1], o_ref.shape[2]
    W = width

    # Clear the zero-extended buffer ONCE per grid step. Both conv stages only
    # overwrite the activation region [W+1, W+1+HW); the halo stays zero. This
    # is per-step (not program_id==0-gated), so it is safe under megacore
    # sharding of the batch grid axis.
    xex[...] = jnp.zeros(xex.shape, xex.dtype)

    x = x_ref[0]                                        # (C, HW) f32

    def conv3x3(act, w_ref):
        """'same' 3x3 conv of a (C, HW) activation -> (C, HW) f32."""
        # Write the activation into the zero-extended slab so every shifted
        # tap is a static, in-bounds lane slice (in-kernel 'same' padding).
        xex[:, pl.ds(W + 1, HW)] = act
        for dy in range(3):
            for dx in range(3):
                k = dy * 3 + dx
                off = (dy - 1) * W + (dx - 1)           # static shift
                tap = xex[:, pl.ds(W + 1 + off, HW)].astype(patches.dtype)
                # bf16 * bf16 mask (exact 0/1): kills row-wraparound taps.
                patches[pl.ds(k * C, C), :] = tap * mask_ref[pl.ds(k, 1), :]
        # Single MXU matmul, K = 9*C, bf16 operands, f32 accumulation.
        return jnp.dot(w_ref[...], patches[...],
                       preferred_element_type=jnp.float32)

    # ---- stage 1: conv1 + BN1 + ReLU (stays on-chip) -------------------------
    h1 = conv3x3(x, w1_ref)
    h1 = jnp.maximum(h1 * s1_ref[...] + b1_ref[...], 0.0)          # f32 epilogue

    # ---- stage 2: conv2 + BN2 + residual + ReLU ------------------------------
    h2 = conv3x3(h1, w2_ref)
    h2 = h2 * s2_ref[...] + b2_ref[...] + x                        # residual add
    o_ref[0] = jnp.maximum(h2, 0.0).astype(o_ref.dtype)


# ----------------------------- parameter prep --------------------------------

def _fold_bn(gamma, beta, mean, var, eps=1e-5):
    scale = gamma / jnp.sqrt(var + eps)
    return scale, beta - mean * scale


def prepare_params(params, H, W, eps=1e-5):
    """One-time inference-constant prep (hoisted out of the forward pass):
    fold BN, convert conv weights OIHW -> (Cout, 9*Cin) im2col layout in bf16,
    and build the 9 per-tap boundary masks implementing 'same' zero padding."""
    C = params["w1_oihw"].shape[0]

    def to_im2col(w_oihw):                  # OIHW -> (Cout,3,3,Cin) -> (Cout,9Cin)
        return (jnp.transpose(w_oihw, (0, 2, 3, 1))
                .reshape(C, 9 * C).astype(jnp.bfloat16))

    s1, b1 = _fold_bn(*params["bn1"], eps=eps)
    s2, b2 = _fold_bn(*params["bn2"], eps=eps)

    hh, ww = np.meshgrid(np.arange(H), np.arange(W), indexing="ij")
    mask = np.zeros((9, H * W), np.float32)
    for dy in range(3):
        for dx in range(3):
            valid = ((hh + dy - 1 >= 0) & (hh + dy - 1 < H) &
                     (ww + dx - 1 >= 0) & (ww + dx - 1 < W))
            mask[dy * 3 + dx] = valid.reshape(-1)

    return {
        "w1": to_im2col(params["w1_oihw"]),
        "w2": to_im2col(params["w2_oihw"]),
        "s1": s1.reshape(C, 1).astype(jnp.float32),
        "b1": b1.reshape(C, 1).astype(jnp.float32),
        "s2": s2.reshape(C, 1).astype(jnp.float32),
        "b2": b2.reshape(C, 1).astype(jnp.float32),
        "mask": jnp.asarray(mask).astype(jnp.bfloat16),   # exact 0/1 in bf16
    }


# ------------------------------ host wrapper ----------------------------------

@jax.jit
def basic_block_forward(x_nchw, prep):
    """BasicBlock forward (stride=1, downsample=None). NCHW in / NCHW out."""
    N, C, H, W = x_nchw.shape
    HW = H * W
    x = x_nchw.reshape(N, C, HW)            # free: NCHW kept, spatial flattened

    cost = pl.CostEstimate(
        flops=2 * (2 * N * HW * 9 * C * C),                      # two 3x3 convs
        transcendentals=0,
        bytes_accessed=2 * N * C * HW * 4 + 2 * C * 9 * C * 2 + 9 * HW * 2,
    )

    out = pl.pallas_call(
        functools.partial(basic_block_kernel, width=W),
        out_shape=jax.ShapeDtypeStruct((N, C, HW), x_nchw.dtype),
        grid=(N,),
        in_specs=[
            pl.BlockSpec((1, C, HW), lambda n: (n, 0, 0)),   # x (also residual)
            pl.BlockSpec((9, HW), lambda n: (0, 0)),         # padding masks bf16
            pl.BlockSpec((C, 9 * C), lambda n: (0, 0)),      # w1 (im2col, bf16)
            pl.BlockSpec((C, 1), lambda n: (0, 0)),          # bn1 scale
            pl.BlockSpec((C, 1), lambda n: (0, 0)),          # bn1 shift
            pl.BlockSpec((C, 9 * C), lambda n: (0, 0)),      # w2 (im2col, bf16)
            pl.BlockSpec((C, 1), lambda n: (0, 0)),          # bn2 scale
            pl.BlockSpec((C, 1), lambda n: (0, 0)),          # bn2 shift
        ],
        out_specs=pl.BlockSpec((1, C, HW), lambda n: (n, 0, 0)),
        scratch_shapes=[
            pltpu.VMEM((C, HW + 2 * W + 2), jnp.float32),    # zero-extended act
            pltpu.VMEM((9 * C, HW), jnp.bfloat16),           # im2col patches
        ],
        compiler_params=pltpu.CompilerParams(
            dimension_semantics=("parallel",),
        ),
        cost_estimate=cost,
    )(x, prep["mask"], prep["w1"], prep["s1"], prep["b1"],
      prep["w2"], prep["s2"], prep["b2"])

    return out.reshape(N, C, H, W)


# ------------------------------- reference -------------------------------------

def ref_basic_block(x_nchw, params, eps=1e-5):
    def conv(x, w_oihw):
        return lax.conv_general_dilated(
            x, w_oihw, window_strides=(1, 1), padding="SAME",
            dimension_numbers=("NCHW", "OIHW", "NCHW"))

    def bn(x, g, b, m, v):
        g, b, m, v = (t[None, :, None, None] for t in (g, b, m, v))
        return g * (x - m) / jnp.sqrt(v + eps) + b

    out = jax.nn.relu(bn(conv(x_nchw, params["w1_oihw"]), *params["bn1"]))
    out = bn(conv(out, params["w2_oihw"]), *params["bn2"])
    return jax.nn.relu(out + x_nchw)


# --------------------------------- main -----------------------------------------

if __name__ == "__main__":
    N, C, H, W = 2, 8, 16, 16       # inplanes == planes == 8, stride = 1
    key = jax.random.PRNGKey(0)
    kx, kw1, kw2, kg1, kb1, km1, kv1, kg2, kb2, km2, kv2 = jax.random.split(key, 11)

    x = jax.random.normal(kx, (N, C, H, W), jnp.float32)

    params = {
        "w1_oihw": 0.1 * jax.random.normal(kw1, (C, C, 3, 3), jnp.float32),
        "w2_oihw": 0.1 * jax.random.normal(kw2, (C, C, 3, 3), jnp.float32),
        "bn1": (
            1.0 + 0.1 * jax.random.normal(kg1, (C,), jnp.float32),   # gamma
            0.1 * jax.random.normal(kb1, (C,), jnp.float32),         # beta
            0.1 * jax.random.normal(km1, (C,), jnp.float32),         # running_mean
            0.5 + jnp.abs(jax.random.normal(kv1, (C,), jnp.float32)) * 0.5,
        ),
        "bn2": (
            1.0 + 0.1 * jax.random.normal(kg2, (C,), jnp.float32),
            0.1 * jax.random.normal(kb2, (C,), jnp.float32),
            0.1 * jax.random.normal(km2, (C,), jnp.float32),
            0.5 + jnp.abs(jax.random.normal(kv2, (C,), jnp.float32)) * 0.5,
        ),
    }

    prep = prepare_params(params, H, W)          # one-time (inference constants)

    out = basic_block_forward(x, prep)
    out = jax.block_until_ready(out)

    ref = ref_basic_block(x, params)
    assert out.shape == (N, C, H, W)
    # bf16 matmul operands (f32 accumulate / epilogue) -> slightly looser tol.
    assert jnp.allclose(out, ref, atol=5e-2, rtol=5e-2), (
        f"max abs err {jnp.max(jnp.abs(out - ref))}")

    print("KERNEL_OK")
</pallas_src>

<mosaic_0001>
module attributes {stable_mosaic.version = 11 : i64} {
  func.func @basic_block_kernel(%arg0: i32, %arg1: memref<1x8x256xf32, #tpu.memory_space<vmem>>, %arg2: memref<9x256xbf16, #tpu.memory_space<vmem>>, %arg3: memref<8x72xbf16, #tpu.memory_space<vmem>>, %arg4: memref<8x1xf32, #tpu.memory_space<vmem>>, %arg5: memref<8x1xf32, #tpu.memory_space<vmem>>, %arg6: memref<8x72xbf16, #tpu.memory_space<vmem>>, %arg7: memref<8x1xf32, #tpu.memory_space<vmem>>, %arg8: memref<8x1xf32, #tpu.memory_space<vmem>>, %arg9: memref<1x8x256xf32, #tpu.memory_space<vmem>>, %arg10: memref<8x290xf32, #tpu.memory_space<vmem>>, %arg11: memref<72x256xbf16, #tpu.memory_space<vmem>>) attributes {dimension_semantics = [#tpu.dimension_semantics<parallel>], iteration_bounds = array<i64: 2>, scalar_prefetch = 0 : i64, scratch_operands = 2 : i64, tpu.core_type = #tpu.core_type<tc>, window_params = [{transform_indices = @transform_0, window_bounds = array<i64: 1, 8, 256>}, {pipeline_mode = #tpu.pipeline_mode<synchronous>, transform_indices = @transform_1, window_bounds = array<i64: 9, 256>}, {pipeline_mode = #tpu.pipeline_mode<synchronous>, transform_indices = @transform_2, window_bounds = array<i64: 8, 72>}, {pipeline_mode = #tpu.pipeline_mode<synchronous>, transform_indices = @transform_3, window_bounds = array<i64: 8, 1>}, {pipeline_mode = #tpu.pipeline_mode<synchronous>, transform_indices = @transform_4, window_bounds = array<i64: 8, 1>}, {pipeline_mode = #tpu.pipeline_mode<synchronous>, transform_indices = @transform_5, window_bounds = array<i64: 8, 72>}, {pipeline_mode = #tpu.pipeline_mode<synchronous>, transform_indices = @transform_6, window_bounds = array<i64: 8, 1>}, {pipeline_mode = #tpu.pipeline_mode<synchronous>, transform_indices = @transform_7, window_bounds = array<i64: 8, 1>}, {transform_indices = @transform_8, window_bounds = array<i64: 1, 8, 256>}]} {
    %cst = arith.constant 0.000000e+00 : f32
    %0 = vector.broadcast %cst : f32 to vector<8x290xf32>
    %c0 = arith.constant 0 : index
    %c0_0 = arith.constant 0 : index
    %1 = vector.load %arg10[%c0, %c0_0] : memref<8x290xf32, #tpu.memory_space<vmem>>, vector<8x290xf32>
    tpu.vector_store %arg10[%c0, %c0_0], %0 {strides = array<i32>} : memref<8x290xf32, #tpu.memory_space<vmem>>, vector<8x290xf32>,
    %c0_1 = arith.constant 0 : index
    %c0_2 = arith.constant 0 : index
    %c0_3 = arith.constant 0 : index
    %2 = vector.load %arg1[%c0_1, %c0_2, %c0_3] : memref<1x8x256xf32, #tpu.memory_space<vmem>>, vector<1x8x256xf32>
    %3 = vector.shape_cast %2 : vector<1x8x256xf32> to vector<8x256xf32>
    %c0_4 = arith.constant 0 : index
    %c17 = arith.constant 17 : index
    %4 = vector.load %arg10[%c0_4, %c17] : memref<8x290xf32, #tpu.memory_space<vmem>>, vector<8x256xf32>
    tpu.vector_store %arg10[%c0_4, %c17], %3 {strides = array<i32>} : memref<8x290xf32, #tpu.memory_space<vmem>>, vector<8x256xf32>,
    %c0_5 = arith.constant 0 : index
    %c0_6 = arith.constant 0 : index
    %5 = vector.load %arg10[%c0_5, %c0_6] : memref<8x290xf32, #tpu.memory_space<vmem>>, vector<8x256xf32>
    %6 = arith.truncf %5 : vector<8x256xf32> to vector<8x256xbf16>
    %c0_7 = arith.constant 0 : index
    %c0_8 = arith.constant 0 : index
    %7 = vector.load %arg2[%c0_7, %c0_8] : memref<9x256xbf16, #tpu.memory_space<vmem>>, vector<1x256xbf16>
    %8 = vector.broadcast %7 : vector<1x256xbf16> to vector<8x256xbf16>
    %9 = arith.mulf %6, %8 : vector<8x256xbf16>
    %c0_9 = arith.constant 0 : index
    %c0_10 = arith.constant 0 : index
    %10 = vector.load %arg11[%c0_9, %c0_10] : memref<72x256xbf16, #tpu.memory_space<vmem>>, vector<8x256xbf16>
    tpu.vector_store %arg11[%c0_9, %c0_10], %9 {strides = array<i32>} : memref<72x256xbf16, #tpu.memory_space<vmem>>, vector<8x256xbf16>,
    %c0_11 = arith.constant 0 : index
    %c1 = arith.constant 1 : index
    %11 = vector.load %arg10[%c0_11, %c1] : memref<8x290xf32, #tpu.memory_space<vmem>>, vector<8x256xf32>
    %12 = arith.truncf %11 : vector<8x256xf32> to vector<8x256xbf16>
    %c1_12 = arith.constant 1 : index
    %c0_13 = arith.constant 0 : index
    %13 = vector.load %arg2[%c1_12, %c0_13] : memref<9x256xbf16, #tpu.memory_space<vmem>>, vector<1x256xbf16>
    %14 = vector.broadcast %13 : vector<1x256xbf16> to vector<8x256xbf16>
    %15 = arith.mulf %12, %14 : vector<8x256xbf16>
    %c8 = arith.constant 8 : index
    %c0_14 = arith.constant 0 : index
    %16 = vector.load %arg11[%c8, %c0_14] : memref<72x256xbf16, #tpu.memory_space<vmem>>, vector<8x256xbf16>
    tpu.vector_store %arg11[%c8, %c0_14], %15 {strides = array<i32>} : memref<72x256xbf16, #tpu.memory_space<vmem>>, vector<8x256xbf16>,
    %c0_15 = arith.constant 0 : index
    %c2 = arith.constant 2 : index
    %17 = vector.load %arg10[%c0_15, %c2] : memref<8x290xf32, #tpu.memory_space<vmem>>, vector<8x256xf32>
    %18 = arith.truncf %17 : vector<8x256xf32> to vector<8x256xbf16>
    %c2_16 = arith.constant 2 : index
    %c0_17 = arith.constant 0 : index
    %19 = vector.load %arg2[%c2_16, %c0_17] : memref<9x256xbf16, #tpu.memory_space<vmem>>, vector<1x256xbf16>
    %20 = vector.broadcast %19 : vector<1x256xbf16> to vector<8x256xbf16>
    %21 = arith.mulf %18, %20 : vector<8x256xbf16>
    %c16 = arith.constant 16 : index
    %c0_18 = arith.constant 0 : index
    %22 = vector.load %arg11[%c16, %c0_18] : memref<72x256xbf16, #tpu.memory_space<vmem>>, vector<8x256xbf16>
    tpu.vector_store %arg11[%c16, %c0_18], %21 {strides = array<i32>} : memref<72x256xbf16, #tpu.memory_space<vmem>>, vector<8x256xbf16>,
    %c0_19 = arith.constant 0 : index
    %c16_20 = arith.constant 16 : index
    %23 = vector.load %arg10[%c0_19, %c16_20] : memref<8x290xf32, #tpu.memory_space<vmem>>, vector<8x256xf32>
    %24 = arith.truncf %23 : vector<8x256xf32> to vector<8x256xbf16>
    %c3 = arith.constant 3 : index
    %c0_21 = arith.constant 0 : index
    %25 = vector.load %arg2[%c3, %c0_21] : memref<9x256xbf16, #tpu.memory_space<vmem>>, vector<1x256xbf16>
    %26 = vector.broadcast %25 : vector<1x256xbf16> to vector<8x256xbf16>
    %27 = arith.mulf %24, %26 : vector<8x256xbf16>
    %c24 = arith.constant 24 : index
    %c0_22 = arith.constant 0 : index
    %28 = vector.load %arg11[%c24, %c0_22] : memref<72x256xbf16, #tpu.memory_space<vmem>>, vector<8x256xbf16>
    tpu.vector_store %arg11[%c24, %c0_22], %27 {strides = array<i32>} : memref<72x256xbf16, #tpu.memory_space<vmem>>, vector<8x256xbf16>,
    %c0_23 = arith.constant 0 : index
    %c17_24 = arith.constant 17 : index
    %29 = vector.load %arg10[%c0_23, %c17_24] : memref<8x290xf32, #tpu.memory_space<vmem>>, vector<8x256xf32>
    %30 = arith.truncf %29 : vector<8x256xf32> to vector<8x256xbf16>
    %c4 = arith.constant 4 : index
    %c0_25 = arith.constant 0 : index
    %31 = vector.load %arg2[%c4, %c0_25] : memref<9x256xbf16, #tpu.memory_space<vmem>>, vector<1x256xbf16>
    %32 = vector.broadcast %31 : vector<1x256xbf16> to vector<8x256xbf16>
    %33 = arith.mulf %30, %32 : vector<8x256xbf16>
    %c32 = arith.constant 32 : index
    %c0_26 = arith.constant 0 : index
    %34 = vector.load %arg11[%c32, %c0_26] : memref<72x256xbf16, #tpu.memory_space<vmem>>, vector<8x256xbf16>
    tpu.vector_store %arg11[%c32, %c0_26], %33 {strides = array<i32>} : memref<72x256xbf16, #tpu.memory_space<vmem>>, vector<8x256xbf16>,
    %c0_27 = arith.constant 0 : index
    %c18 = arith.constant 18 : index
    %35 = vector.load %arg10[%c0_27, %c18] : memref<8x290xf32, #tpu.memory_space<vmem>>, vector<8x256xf32>
    %36 = arith.truncf %35 : vector<8x256xf32> to vector<8x256xbf16>
    %c5 = arith.constant 5 : index
    %c0_28 = arith.constant 0 : index
    %37 = vector.load %arg2[%c5, %c0_28] : memref<9x256xbf16, #tpu.memory_space<vmem>>, vector<1x256xbf16>
    %38 = vector.broadcast %37 : vector<1x256xbf16> to vector<8x256xbf16>
    %39 = arith.mulf %36, %38 : vector<8x256xbf16>
    %c40 = arith.constant 40 : index
    %c0_29 = arith.constant 0 : index
    %40 = vector.load %arg11[%c40, %c0_29] : memref<72x256xbf16, #tpu.memory_space<vmem>>, vector<8x256xbf16>
    tpu.vector_store %arg11[%c40, %c0_29], %39 {strides = array<i32>} : memref<72x256xbf16, #tpu.memory_space<vmem>>, vector<8x256xbf16>,
    %c0_30 = arith.constant 0 : index
    %c32_31 = arith.constant 32 : index
    %41 = vector.load %arg10[%c0_30, %c32_31] : memref<8x290xf32, #tpu.memory_space<vmem>>, vector<8x256xf32>
    %42 = arith.truncf %41 : vector<8x256xf32> to vector<8x256xbf16>
    %c6 = arith.constant 6 : index
    %c0_32 = arith.constant 0 : index
    %43 = vector.load %arg2[%c6, %c0_32] : memref<9x256xbf16, #tpu.memory_space<vmem>>, vector<1x256xbf16>
    %44 = vector.broadcast %43 : vector<1x256xbf16> to vector<8x256xbf16>
    %45 = arith.mulf %42, %44 : vector<8x256xbf16>
    %c48 = arith.constant 48 : index
    %c0_33 = arith.constant 0 : index
    %46 = vector.load %arg11[%c48, %c0_33] : memref<72x256xbf16, #tpu.memory_space<vmem>>, vector<8x256xbf16>
    tpu.vector_store %arg11[%c48, %c0_33], %45 {strides = array<i32>} : memref<72x256xbf16, #tpu.memory_space<vmem>>, vector<8x256xbf16>,
    %c0_34 = arith.constant 0 : index
    %c33 = arith.constant 33 : index
    %47 = vector.load %arg10[%c0_34, %c33] : memref<8x290xf32, #tpu.memory_space<vmem>>, vector<8x256xf32>
    %48 = arith.truncf %47 : vector<8x256xf32> to vector<8x256xbf16>
    %c7 = arith.constant 7 : index
    %c0_35 = arith.constant 0 : index
    %49 = vector.load %arg2[%c7, %c0_35] : memref<9x256xbf16, #tpu.memory_space<vmem>>, vector<1x256xbf16>
    %50 = vector.broadcast %49 : vector<1x256xbf16> to vector<8x256xbf16>
    %51 = arith.mulf %48, %50 : vector<8x256xbf16>
    %c56 = arith.constant 56 : index
    %c0_36 = arith.constant 0 : index
    %52 = vector.load %arg11[%c56, %c0_36] : memref<72x256xbf16, #tpu.memory_space<vmem>>, vector<8x256xbf16>
    tpu.vector_store %arg11[%c56, %c0_36], %51 {strides = array<i32>} : memref<72x256xbf16, #tpu.memory_space<vmem>>, vector<8x256xbf16>,
    %c0_37 = arith.constant 0 : index
    %c34 = arith.constant 34 : index
    %53 = vector.load %arg10[%c0_37, %c34] : memref<8x290xf32, #tpu.memory_space<vmem>>, vector<8x256xf32>
    %54 = arith.truncf %53 : vector<8x256xf32> to vector<8x256xbf16>
    %c8_38 = arith.constant 8 : index
    %c0_39 = arith.constant 0 : index
    %55 = vector.load %arg2[%c8_38, %c0_39] : memref<9x256xbf16, #tpu.memory_space<vmem>>, vector<1x256xbf16>
    %56 = vector.broadcast %55 : vector<1x256xbf16> to vector<8x256xbf16>
    %57 = arith.mulf %54, %56 : vector<8x256xbf16>
    %c64 = arith.constant 64 : index
    %c0_40 = arith.constant 0 : index
    %58 = vector.load %arg11[%c64, %c0_40] : memref<72x256xbf16, #tpu.memory_space<vmem>>, vector<8x256xbf16>
    tpu.vector_store %arg11[%c64, %c0_40], %57 {strides = array<i32>} : memref<72x256xbf16, #tpu.memory_space<vmem>>, vector<8x256xbf16>,
    %c0_41 = arith.constant 0 : index
    %c0_42 = arith.constant 0 : index
    %59 = vector.load %arg3[%c0_41, %c0_42] : memref<8x72xbf16, #tpu.memory_space<vmem>>, vector<8x72xbf16>
    %c0_43 = arith.constant 0 : index
    %c0_44 = arith.constant 0 : index
    %60 = vector.load %arg11[%c0_43, %c0_44] : memref<72x256xbf16, #tpu.memory_space<vmem>>, vector<72x256xbf16>
    %cst_45 = arith.constant dense<0.000000e+00> : vector<8x256xf32>
    %61 = tpu.matmul %59, %60, %cst_45 {dimension_numbers = #tpu.dot_dimension_numbers<[1], [0], [0], [1], [0, 0, 1, 1], [], []>} : vector<8x72xbf16>, vector<72x256xbf16>, vector<8x256xf32> -> vector<8x256xf32>
    %c0_46 = arith.constant 0 : index
    %c0_47 = arith.constant 0 : index
    %62 = vector.load %arg4[%c0_46, %c0_47] : memref<8x1xf32, #tpu.memory_space<vmem>>, vector<8x1xf32>
    %63 = vector.broadcast %62 : vector<8x1xf32> to vector<8x256xf32>
    %64 = arith.mulf %61, %63 : vector<8x256xf32>
    %c0_48 = arith.constant 0 : index
    %c0_49 = arith.constant 0 : index
    %65 = vector.load %arg5[%c0_48, %c0_49] : memref<8x1xf32, #tpu.memory_space<vmem>>, vector<8x1xf32>
    %66 = vector.broadcast %65 : vector<8x1xf32> to vector<8x256xf32>
    %67 = arith.addf %64, %66 : vector<8x256xf32>
    %cst_50 = arith.constant 0.000000e+00 : f32
    %68 = vector.broadcast %cst_50 : f32 to vector<8x256xf32>
    %69 = arith.maximumf %67, %68 : vector<8x256xf32>
    %c0_51 = arith.constant 0 : index
    %c17_52 = arith.constant 17 : index
    %70 = vector.load %arg10[%c0_51, %c17_52] : memref<8x290xf32, #tpu.memory_space<vmem>>, vector<8x256xf32>
    tpu.vector_store %arg10[%c0_51, %c17_52], %69 {strides = array<i32>} : memref<8x290xf32, #tpu.memory_space<vmem>>, vector<8x256xf32>,
    %c0_53 = arith.constant 0 : index
    %c0_54 = arith.constant 0 : index
    %71 = vector.load %arg10[%c0_53, %c0_54] : memref<8x290xf32, #tpu.memory_space<vmem>>, vector<8x256xf32>
    %72 = arith.truncf %71 : vector<8x256xf32> to vector<8x256xbf16>
    %c0_55 = arith.constant 0 : index
    %c0_56 = arith.constant 0 : index
    %73 = vector.load %arg2[%c0_55, %c0_56] : memref<9x256xbf16, #tpu.memory_space<vmem>>, vector<1x256xbf16>
    %74 = vector.broadcast %73 : vector<1x256xbf16> to vector<8x256xbf16>
    %75 = arith.mulf %72, %74 : vector<8x256xbf16>
    %c0_57 = arith.constant 0 : index
    %c0_58 = arith.constant 0 : index
    %76 = vector.load %arg11[%c0_57, %c0_58] : memref<72x256xbf16, #tpu.memory_space<vmem>>, vector<8x256xbf16>
    tpu.vector_store %arg11[%c0_57, %c0_58], %75 {strides = array<i32>} : memref<72x256xbf16, #tpu.memory_space<vmem>>, vector<8x256xbf16>,
    %c0_59 = arith.constant 0 : index
    %c1_60 = arith.constant 1 : index
    %77 = vector.load %arg10[%c0_59, %c1_60] : memref<8x290xf32, #tpu.memory_space<vmem>>, vector<8x256xf32>
    %78 = arith.truncf %77 : vector<8x256xf32> to vector<8x256xbf16>
    %c1_61 = arith.constant 1 : index
    %c0_62 = arith.constant 0 : index
    %79 = vector.load %arg2[%c1_61, %c0_62] : memref<9x256xbf16, #tpu.memory_space<vmem>>, vector<1x256xbf16>
    %80 = vector.broadcast %79 : vector<1x256xbf16> to vector<8x256xbf16>
    %81 = arith.mulf %78, %80 : vector<8x256xbf16>
    %c8_63 = arith.constant 8 : index
    %c0_64 = arith.constant 0 : index
    %82 = vector.load %arg11[%c8_63, %c0_64] : memref<72x256xbf16, #tpu.memory_space<vmem>>, vector<8x256xbf16>
    tpu.vector_store %arg11[%c8_63, %c0_64], %81 {strides = array<i32>} : memref<72x256xbf16, #tpu.memory_space<vmem>>, vector<8x256xbf16>,
    %c0_65 = arith.constant 0 : index
    %c2_66 = arith.constant 2 : index
    %83 = vector.load %arg10[%c0_65, %c2_66] : memref<8x290xf32, #tpu.memory_space<vmem>>, vector<8x256xf32>
    %84 = arith.truncf %83 : vector<8x256xf32> to vector<8x256xbf16>
    %c2_67 = arith.constant 2 : index
    %c0_68 = arith.constant 0 : index
    %85 = vector.load %arg2[%c2_67, %c0_68] : memref<9x256xbf16, #tpu.memory_space<vmem>>, vector<1x256xbf16>
    %86 = vector.broadcast %85 : vector<1x256xbf16> to vector<8x256xbf16>
    %87 = arith.mulf %84, %86 : vector<8x256xbf16>
    %c16_69 = arith.constant 16 : index
    %c0_70 = arith.constant 0 : index
    %88 = vector.load %arg11[%c16_69, %c0_70] : memref<72x256xbf16, #tpu.memory_space<vmem>>, vector<8x256xbf16>
    tpu.vector_store %arg11[%c16_69, %c0_70], %87 {strides = array<i32>} : memref<72x256xbf16, #tpu.memory_space<vmem>>, vector<8x256xbf16>,
    %c0_71 = arith.constant 0 : index
    %c16_72 = arith.constant 16 : index
    %89 = vector.load %arg10[%c0_71, %c16_72] : memref<8x290xf32, #tpu.memory_space<vmem>>, vector<8x256xf32>
    %90 = arith.truncf %89 : vector<8x256xf32> to vector<8x256xbf16>
    %c3_73 = arith.constant 3 : index
    %c0_74 = arith.constant 0 : index
    %91 = vector.load %arg2[%c3_73, %c0_74] : memref<9x256xbf16, #tpu.memory_space<vmem>>, vector<1x256xbf16>
    %92 = vector.broadcast %91 : vector<1x256xbf16> to vector<8x256xbf16>
    %93 = arith.mulf %90, %92 : vector<8x256xbf16>
    %c24_75 = arith.constant 24 : index
    %c0_76 = arith.constant 0 : index
    %94 = vector.load %arg11[%c24_75, %c0_76] : memref<72x256xbf16, #tpu.memory_space<vmem>>, vector<8x256xbf16>
    tpu.vector_store %arg11[%c24_75, %c0_76], %93 {strides = array<i32>} : memref<72x256xbf16, #tpu.memory_space<vmem>>, vector<8x256xbf16>,
    %c0_77 = arith.constant 0 : index
    %c17_78 = arith.constant 17 : index
    %95 = vector.load %arg10[%c0_77, %c17_78] : memref<8x290xf32, #tpu.memory_space<vmem>>, vector<8x256xf32>
    %96 = arith.truncf %95 : vector<8x256xf32> to vector<8x256xbf16>
    %c4_79 = arith.constant 4 : index
    %c0_80 = arith.constant 0 : index
    %97 = vector.load %arg2[%c4_79, %c0_80] : memref<9x256xbf16, #tpu.memory_space<vmem>>, vector<1x256xbf16>
    %98 = vector.broadcast %97 : vector<1x256xbf16> to vector<8x256xbf16>
    %99 = arith.mulf %96, %98 : vector<8x256xbf16>
    %c32_81 = arith.constant 32 : index
    %c0_82 = arith.constant 0 : index
    %100 = vector.load %arg11[%c32_81, %c0_82] : memref<72x256xbf16, #tpu.memory_space<vmem>>, vector<8x256xbf16>
    tpu.vector_store %arg11[%c32_81, %c0_82], %99 {strides = array<i32>} : memref<72x256xbf16, #tpu.memory_space<vmem>>, vector<8x256xbf16>,
    %c0_83 = arith.constant 0 : index
    %c18_84 = arith.constant 18 : index
    %101 = vector.load %arg10[%c0_83, %c18_84] : memref<8x290xf32, #tpu.memory_space<vmem>>, vector<8x256xf32>
    %102 = arith.truncf %101 : vector<8x256xf32> to vector<8x256xbf16>
    %c5_85 = arith.constant 5 : index
    %c0_86 = arith.constant 0 : index
    %103 = vector.load %arg2[%c5_85, %c0_86] : memref<9x256xbf16, #tpu.memory_space<vmem>>, vector<1x256xbf16>
    %104 = vector.broadcast %103 : vector<1x256xbf16> to vector<8x256xbf16>
    %105 = arith.mulf %102, %104 : vector<8x256xbf16>
    %c40_87 = arith.constant 40 : index
    %c0_88 = arith.constant 0 : index
    %106 = vector.load %arg11[%c40_87, %c0_88] : memref<72x256xbf16, #tpu.memory_space<vmem>>, vector<8x256xbf16>
    tpu.vector_store %arg11[%c40_87, %c0_88], %105 {strides = array<i32>} : memref<72x256xbf16, #tpu.memory_space<vmem>>, vector<8x256xbf16>,
    %c0_89 = arith.constant 0 : index
    %c32_90 = arith.constant 32 : index
    %107 = vector.load %arg10[%c0_89, %c32_90] : memref<8x290xf32, #tpu.memory_space<vmem>>, vector<8x256xf32>
    %108 = arith.truncf %107 : vector<8x256xf32> to vector<8x256xbf16>
    %c6_91 = arith.constant 6 : index
    %c0_92 = arith.constant 0 : index
    %109 = vector.load %arg2[%c6_91, %c0_92] : memref<9x256xbf16, #tpu.memory_space<vmem>>, vector<1x256xbf16>
    %110 = vector.broadcast %109 : vector<1x256xbf16> to vector<8x256xbf16>
    %111 = arith.mulf %108, %110 : vector<8x256xbf16>
    %c48_93 = arith.constant 48 : index
    %c0_94 = arith.constant 0 : index
    %112 = vector.load %arg11[%c48_93, %c0_94] : memref<72x256xbf16, #tpu.memory_space<vmem>>, vector<8x256xbf16>
    tpu.vector_store %arg11[%c48_93, %c0_94], %111 {strides = array<i32>} : memref<72x256xbf16, #tpu.memory_space<vmem>>, vector<8x256xbf16>,
    %c0_95 = arith.constant 0 : index
    %c33_96 = arith.constant 33 : index
    %113 = vector.load %arg10[%c0_95, %c33_96] : memref<8x290xf32, #tpu.memory_space<vmem>>, vector<8x256xf32>
    %114 = arith.truncf %113 : vector<8x256xf32> to vector<8x256xbf16>
    %c7_97 = arith.constant 7 : index
    %c0_98 = arith.constant 0 : index
    %115 = vector.load %arg2[%c7_97, %c0_98] : memref<9x256xbf16, #tpu.memory_space<vmem>>, vector<1x256xbf16>
    %116 = vector.broadcast %115 : vector<1x256xbf16> to vector<8x256xbf16>
    %117 = arith.mulf %114, %116 : vector<8x256xbf16>
    %c56_99 = arith.constant 56 : index
    %c0_100 = arith.constant 0 : index
    %118 = vector.load %arg11[%c56_99, %c0_100] : memref<72x256xbf16, #tpu.memory_space<vmem>>, vector<8x256xbf16>
    tpu.vector_store %arg11[%c56_99, %c0_100], %117 {strides = array<i32>} : memref<72x256xbf16, #tpu.memory_space<vmem>>, vector<8x256xbf16>,
    %c0_101 = arith.constant 0 : index
    %c34_102 = arith.constant 34 : index
    %119 = vector.load %arg10[%c0_101, %c34_102] : memref<8x290xf32, #tpu.memory_space<vmem>>, vector<8x256xf32>
    %120 = arith.truncf %119 : vector<8x256xf32> to vector<8x256xbf16>
    %c8_103 = arith.constant 8 : index
    %c0_104 = arith.constant 0 : index
    %121 = vector.load %arg2[%c8_103, %c0_104] : memref<9x256xbf16, #tpu.memory_space<vmem>>, vector<1x256xbf16>
    %122 = vector.broadcast %121 : vector<1x256xbf16> to vector<8x256xbf16>
    %123 = arith.mulf %120, %122 : vector<8x256xbf16>
    %c64_105 = arith.constant 64 : index
    %c0_106 = arith.constant 0 : index
    %124 = vector.load %arg11[%c64_105, %c0_106] : memref<72x256xbf16, #tpu.memory_space<vmem>>, vector<8x256xbf16>
    tpu.vector_store %arg11[%c64_105, %c0_106], %123 {strides = array<i32>} : memref<72x256xbf16, #tpu.memory_space<vmem>>, vector<8x256xbf16>,
    %c0_107 = arith.constant 0 : index
    %c0_108 = arith.constant 0 : index
    %125 = vector.load %arg6[%c0_107, %c0_108] : memref<8x72xbf16, #tpu.memory_space<vmem>>, vector<8x72xbf16>
    %c0_109 = arith.constant 0 : index
    %c0_110 = arith.constant 0 : index
    %126 = vector.load %arg11[%c0_109, %c0_110] : memref<72x256xbf16, #tpu.memory_space<vmem>>, vector<72x256xbf16>
    %cst_111 = arith.constant dense<0.000000e+00> : vector<8x256xf32>
    %127 = tpu.matmul %125, %126, %cst_111 {dimension_numbers = #tpu.dot_dimension_numbers<[1], [0], [0], [1], [0, 0, 1, 1], [], []>} : vector<8x72xbf16>, vector<72x256xbf16>, vector<8x256xf32> -> vector<8x256xf32>
    %c0_112 = arith.constant 0 : index
    %c0_113 = arith.constant 0 : index
    %128 = vector.load %arg7[%c0_112, %c0_113] : memref<8x1xf32, #tpu.memory_space<vmem>>, vector<8x1xf32>
    %129 = vector.broadcast %128 : vector<8x1xf32> to vector<8x256xf32>
    %130 = arith.mulf %127, %129 : vector<8x256xf32>
    %c0_114 = arith.constant 0 : index
    %c0_115 = arith.constant 0 : index
    %131 = vector.load %arg8[%c0_114, %c0_115] : memref<8x1xf32, #tpu.memory_space<vmem>>, vector<8x1xf32>
    %132 = vector.broadcast %131 : vector<8x1xf32> to vector<8x256xf32>
    %133 = arith.addf %130, %132 : vector<8x256xf32>
    %134 = arith.addf %133, %3 : vector<8x256xf32>
    %cst_116 = arith.constant 0.000000e+00 : f32
    %135 = vector.broadcast %cst_116 : f32 to vector<8x256xf32>
    %136 = arith.maximumf %134, %135 : vector<8x256xf32>
    %c0_117 = arith.constant 0 : index
    %c0_118 = arith.constant 0 : index
    %c0_119 = arith.constant 0 : index
    %137 = vector.load %arg9[%c0_117, %c0_118, %c0_119] : memref<1x8x256xf32, #tpu.memory_space<vmem>>, vector<1x8x256xf32>
    %138 = vector.shape_cast %137 : vector<1x8x256xf32> to vector<8x256xf32>
    %139 = vector.shape_cast %136 : vector<8x256xf32> to vector<1x8x256xf32>
    tpu.vector_store %arg9[%c0_117, %c0_118, %c0_119], %139 {strides = array<i32>} : memref<1x8x256xf32, #tpu.memory_space<vmem>>, vector<1x8x256xf32>,
    return
  }
  func.func @transform_0(%arg0: i32) -> (i32, i32, i32) {
    %c0_i32 = arith.constant 0 : i32
    %c0_i32_0 = arith.constant 0 : i32
    %c0_i32_1 = arith.constant 0 : i32
    return %arg0, %c0_i32, %c0_i32_0 : i32, i32, i32
  }
  func.func @transform_1(%arg0: i32) -> (i32, i32) {
    %c0_i32 = arith.constant 0 : i32
    %c0_i32_0 = arith.constant 0 : i32
    %c0_i32_1 = arith.constant 0 : i32
    return %c0_i32, %c0_i32_0 : i32, i32
  }
  func.func @transform_2(%arg0: i32) -> (i32, i32) {
    %c0_i32 = arith.constant 0 : i32
    %c0_i32_0 = arith.constant 0 : i32
    %c0_i32_1 = arith.constant 0 : i32
    return %c0_i32, %c0_i32_0 : i32, i32
  }
  func.func @transform_3(%arg0: i32) -> (i32, i32) {
    %c0_i32 = arith.constant 0 : i32
    %c0_i32_0 = arith.constant 0 : i32
    %c0_i32_1 = arith.constant 0 : i32
    return %c0_i32, %c0_i32_0 : i32, i32
  }
  func.func @transform_4(%arg0: i32) -> (i32, i32) {
    %c0_i32 = arith.constant 0 : i32
    %c0_i32_0 = arith.constant 0 : i32
    %c0_i32_1 = arith.constant 0 : i32
    return %c0_i32, %c0_i32_0 : i32, i32
  }
  func.func @transform_5(%arg0: i32) -> (i32, i32) {
    %c0_i32 = arith.constant 0 : i32
    %c0_i32_0 = arith.constant 0 : i32
    %c0_i32_1 = arith.constant 0 : i32
    return %c0_i32, %c0_i32_0 : i32, i32
  }
  func.func @transform_6(%arg0: i32) -> (i32, i32) {
    %c0_i32 = arith.constant 0 : i32
    %c0_i32_0 = arith.constant 0 : i32
    %c0_i32_1 = arith.constant 0 : i32
    return %c0_i32, %c0_i32_0 : i32, i32
  }
  func.func @transform_7(%arg0: i32) -> (i32, i32) {
    %c0_i32 = arith.constant 0 : i32
    %c0_i32_0 = arith.constant 0 : i32
    %c0_i32_1 = arith.constant 0 : i32
    return %c0_i32, %c0_i32_0 : i32, i32
  }
  func.func @transform_8(%arg0: i32) -> (i32, i32, i32) {
    %c0_i32 = arith.constant 0 : i32
    %c0_i32_0 = arith.constant 0 : i32
    %c0_i32_1 = arith.constant 0 : i32
    return %arg0, %c0_i32, %c0_i32_0 : i32, i32, i32
  }
}

</mosaic_0001>

<bundles_post_ra>
// kernel: basic_block_forward.1
= control target key start
LH: loop header
LB: loop body
LE: loop exit
PB: predicated region body
PF: predicated region fallthrough
CT: control target
= control target key end

     0   :  { %s1905_s27 = smov 0   ;;  %s2264_s0 = inlined_call_operand.vmem [shape: f32[2,8,256], index: 0, kind: input, shape index: {}]   ;;  %s2265_s1 = inlined_call_operand.vmem [shape: bf16[9,256], index: 1, kind: input, shape index: {}]   ;;  %s2266_s2 = inlined_call_operand.vmem [shape: bf16[8,72], index: 2, kind: input, shape index: {}]   ;;  %s2267_s3 = inlined_call_operand.vmem [shape: f32[8,1], index: 3, kind: input, shape index: {}]   ;;  %s2268_s4 = inlined_call_operand.vmem [shape: f32[8,1], index: 4, kind: input, shape index: {}]   ;;  %s2269_s5 = inlined_call_operand.vmem [shape: bf16[8,72], index: 5, kind: input, shape index: {}]   ;;  %s2270_s6 = inlined_call_operand.vmem [shape: f32[8,1], index: 6, kind: input, shape index: {}]   ;;  %s2271_s7 = inlined_call_operand.vmem [shape: f32[8,1], index: 7, kind: input, shape index: {}]   ;;  %s2272_s8 = inlined_call_operand.vmem [shape: f32[2,8,256], index: 8, kind: output, shape index: {}]  }
   0x1 LB: > { %s1659_s28 = sadd.s32 4294967295, %s1840_s27   ;;  %p1663_p0 = scmp.ge.s32.totalorder %s1840_s27, 1  ;;  %s1840_s27 = sphi %s1905_s27, %s18_s27  }
   0x2   : > { %p262_p1 = scmp.lt.s32.totalorder %s1840_s27, 3 }
   0x4   : > { %p263_p2 = pnand %p1663_p0, %p262_p1 }
   0x5   : > { %p296_p3 = scmp.lt.s32.totalorder (!%p263_p2), %s1659_s28, 1  ;;  %v341_v0 = vlaneseq (!%p263_p2)  ;;  %v429_v1 = vld [vmem:[%s2265_s1] sm:$0x22] (!%p263_p2)  ;;  %v367_v2 = vld [vmem:[%s2265_s1] sm:$0x11] (!%p263_p2)  ;;  %s1842_s17 = smov (!%p263_p2), 17  }
   0x6   : > { %266 = sbr.rel (%p263_p2) target bundleno = 1026 (0x402), region = 52  ;;  %v1676_v3 = vcombine.high (!%p263_p2), %v429_v1, %v429_v1  ;;  %v1671_v4 = vcombine.low (!%p263_p2), %v367_v2, %v367_v2  ;;  %v1672_v5 = vcombine.high (!%p263_p2), %v367_v2, %v367_v2  ;;  %v488_v6 = vld [vmem:[%s2265_s1] sm:$0x22] (!%p263_p2)  ;;  %v1675_v8 = vcombine.low (!%p263_p2), %v429_v1, %v429_v1  ;;  %v549_v21 = vld [vmem:[%s2265_s1] sm:$0x44] (!%p263_p2)  ;;  %s1843_s20 = smov (!%p263_p2), 2  }
   0x7   : > { %v1924_v7 = vshrl.u32 (!%p263_p2), %v341_v0, 7  ;;  %v1679_v11 = vcombine.low (!%p263_p2), %v488_v6, %v488_v6  ;;  %v1680_v15 = vcombine.high (!%p263_p2), %v488_v6, %v488_v6  ;;  %v608_v26 = vld [vmem:[%s2265_s1] sm:$0x44] (!%p263_p2)  ;;  %v1683_v27 = vcombine.low (!%p263_p2), %v549_v21, %v549_v21  ;;  %s1844_s23 = smov (!%p263_p2), 1   ;;  %v669_v39 = vld [vmem:[%s2265_s1] sm:$0x88] (!%p263_p2) }
   0x8   : > { %v443_v9 = vpack.i.b16 (!%p263_p2), %v1676_v3, %v1676_v3  ;;  %v374_v10 = vshrl.u32 (!%p263_p2), %v1671_v4, 16  ;;  %v382_v14 = vshrl.u32 (!%p263_p2), %v1672_v5, 16  ;;  %v436_v19 = vpack.i.b16 (!%p263_p2), %v1675_v8, %v1675_v8  ;;  %v728_v43 = vld [vmem:[%s2265_s1] sm:$0x88] (!%p263_p2)  ;;  %s1846_s30 = smov (!%p263_p2), 16   ;;  %s1847_s11 = smov (!%p263_p2), 18  }
   0x9   : > { %v1928_v12 = vsub.s32 (!%p263_p2), 1, %v1924_v7  ;;  %v1931_v13 = vsub.s32 (!%p263_p2), 0, %v1924_v7  ;;  %v495_v20 = vshrl.u32 (!%p263_p2), %v1679_v11, 16  ;;  %v503_v25 = vshrl.u32 (!%p263_p2), %v1680_v15, 16  ;;  %v789_v60 = vld [vmem:[%s2265_s1 + $0x8] sm:$0x11] (!%p263_p2) }
   0xa   : > { %v375_v16 = vpack.i.b16 (!%p263_p2), %v374_v10, %v374_v10  ;;  %v383_v24 = vpack.i.b16 (!%p263_p2), %v382_v14, %v382_v14  ;;  %v1687_v30 = vcombine.low (!%p263_p2), %v608_v26, %v608_v26  ;;  %v1684_v33 = vcombine.high (!%p263_p2), %v549_v21, %v549_v21  ;;  %s1848_s12 = smov (!%p263_p2), 32   ;;  %s1849_s14 = smov (!%p263_p2), 33  }
   0xb   : > { %v448_v18 = vrot.slane (!%p263_p2), %v443_v9, %v1928_v12  ;;  %v441_v28 = vrot.slane (!%p263_p2), %v436_v19, %v1928_v12  ;;  %v496_v29 = vpack.i.b16 (!%p263_p2), %v495_v20, %v495_v20  ;;  %v504_v32 = vpack.i.b16 (!%p263_p2), %v503_v25, %v503_v25  ;;  %s1850_s15 = smov (!%p263_p2), 34   ;;  %v332_v9 = vld [vmem:[%s2265_s1] sm:$0x11] (!%p263_p2)  ;;  %s1851_s21 = smov (!%p263_p2), 127  }
   0xc   : > { %v380_v23 = vrot.slane (!%p263_p2), %v375_v16, %v1931_v13  ;;  %v388_v31 = vrot.slane (!%p263_p2), %v383_v24, %v1931_v13  ;;  %v1688_v34 = vcombine.high (!%p263_p2), %v608_v26, %v608_v26  ;;  %v556_v35 = vpack.i.b16 (!%p263_p2), %v1683_v27, %v1683_v27  ;;  %s1852_s22 = smov (!%p263_p2), 126   ;;  %s1853_s24 = smov (!%p263_p2), 112  }
   0xd   : > { %s2285_s28 = smov (!%p296_p3, %s1659_s28), 1  ;;  %453 = vrot.lane.b32.xlu1 %v448_v18, %s1843_s20  ;;  %v501_v36 = vrot.slane %v496_v29, %v1928_v12  ;;  %v1959_v37 = vsub.s32 2, %v1924_v7  ;;  %v615_v38 = vshrl.u32 %v1687_v30, 16  ;;  %v509_v40 = vrot.slane %v504_v32, %v1928_v12  ;;  %s1854_s25 = smov 111  }
   0xe   : > { %s2273_s13 = sshll.u32 %s2285_s28, 4  ;;  %v563_v41 = vpack.i.b16 %v1684_v33, %v1684_v33  ;;  %v623_v42 = vshrl.u32 %v1688_v34, 16  ;;  %v1845_v44 = vmov 0.0   ;;  %vm309_vm0 = vcmask 277504   ;;  %s1855_s26 = smov 110  }
   0xf   : > { %s1938_s16 = scalar_lea.vmem %s2264_s0, %s2273_s13  ;;  %307 = vst [vmem:[#allocation2] sm:$0xff] %v1845_v44  ;;  %310 = vst.msk [vmem:[#allocation2 + $0x10] sm:$0xff] %vm309_vm0, %v1845_v44  ;;  %v561_v45 = vrot.slane %v556_v35, %v1959_v37  ;;  %v616_v46 = vpack.i.b16 %v615_v38, %v615_v38  ;;  %v1691_v47 = vcombine.low %v669_v39, %v669_v39  ;;  %v1977_v55 = vsub.s32 3, %v1924_v7  ;;  %s2274_s29 = smov 96  }
  0x10   : > { %v311_v17 = vld [vmem:[%s1938_s16] sm:$0xff]  ;;  %v312_v22 = vld [vmem:[%s1938_s16 + $0x8] sm:$0xff]  ;;  %v1695_v48 = vcombine.low %v728_v43, %v728_v43  ;;  %v568_v49 = vrot.slane %v563_v41, %v1959_v37  ;;  %v624_v50 = vpack.i.b16 %v623_v42, %v623_v42  ;;  %v1692_v51 = vcombine.high %v669_v39, %v669_v39  ;;  %s1857_s9 = smov 95   ;;  %s1859_s10 = smov 94  }
  0x11   : > { %315 = vrot.lane.b32.xlu0 %v311_v17, %s1842_s17  ;;  %391 = vrot.lane.b32.xlu1 %v380_v23, %s1844_s23  ;;  %v1696_v52 = vcombine.high %v728_v43, %v728_v43  ;;  %v621_v53 = vrot.slane %v616_v46, %v1959_v37  ;;  %v676_v54 = vpack.i.b16 %v1691_v47, %v1691_v47  ;;  %vm324_vm1 = vcmask 1047688  }
  0x12   : > { %v735_v56 = vshrl.u32 %v1695_v48, 16  ;;  %v629_v57 = vrot.slane %v624_v50, %v1959_v37  ;;  %v683_v58 = vpack.i.b16 %v1692_v51, %v1692_v51  ;;  %v1699_v63 = vcombine.low %v789_v60, %v789_v60 }
  0x13   : > { %v743_v59 = vshrl.u32 %v1696_v52, 16  ;;  %v681_v61 = vrot.slane %v676_v54, %v1977_v55  ;;  %v1700_v2 = vcombine.high %v789_v60, %v789_v60  ;;  %v1668_v10 = vcombine.low %v332_v9, %v332_v9 }
  0x14   : > { %v736_v62 = vpack.i.b16 %v735_v56, %v735_v56  ;;  %v688_v0 = vrot.slane %v683_v58, %v1977_v55  ;;  %v796_v4 = vpack.i.b16 %v1699_v63, %v1699_v63  ;;  %v1669_v14 = vcombine.high %v332_v9, %v332_v9 }
  0x15   : > { %317 = vrot.lane.b32.xlu0 %v312_v22, %s1842_s17  ;;  %393 = vrot.lane.b32.xlu1 %v388_v31, %s1844_s23  ;;  %v744_v1 = vpack.i.b16 %v743_v59, %v743_v59  ;;  %v803_v6 = vpack.i.b16 %v1700_v2, %v1700_v2  ;;  %vm319_vm2 = vcmask 138240   ;;  %v339_v16 = vpack.i.b16 %v1668_v10, %v1668_v10 }
  0x16   : > { %v741_v3 = vrot.slane %v736_v62, %v1977_v55  ;;  %v801_v7 = vrot.slane %v796_v4, %v1931_v13  ;;  %v346_v18 = vpack.i.b16 %v1669_v14, %v1669_v14  ;;  %vm455_vm3 = vcmask 15360  }
  0x17   : > { %v749_v5 = vrot.slane %v744_v1, %v1977_v55  ;;  %v808_v8 = vrot.slane %v803_v6, %v1931_v13  ;;  %vm395_vm4 = vcmask 7168   ;;  %v344_v21 = vrot.slane %v339_v16, %v1931_v13 }
  0x18   : > { %v351_v25 = vrot.slane %v346_v18, %v1931_v13  ;;  %vm516_vm5 = vcmask 130048   ;;  %vm636_vm6 = vcmask 146432   ;;  %vm695_vm7 = vcmask 261120  }
  0x19   : > { %451 = vrot.lane.b32.xlu0 %v441_v28, %s1843_s20  ;;  %514 = vrot.lane.b32.xlu1 %v509_v40, %s1846_s30  ;;  %vm756_vm8 = vcmask 269312   ;;  %vm417_vm9 = vcmask 1043456   ;;  %vm419_vm10 = vcmask 1039360   ;;  %vm478_vm11 = vcmask 1031168  }
  0x1a   : > { %vm2276_vm12 = vcmask 916480   ;;  %vm598_vm13 = vcmask 908288   ;;  %vm2277_vm14 = vcmask 900096   ;;  %vm718_vm15 = vcmask 785408  }
  0x1d   : > { %512 = vrot.lane.b32.xlu0 %v501_v36, %s1846_s30  ;;  %573 = vrot.lane.b32.xlu1 %v568_v49, %s1842_s17 }
  0x21   : > { %571 = vrot.lane.b32.xlu0 %v561_v45, %s1842_s17  ;;  %634 = vrot.lane.b32.xlu1 %v629_v57, %s1847_s11 }
  0x25   : > { %632 = vrot.lane.b32.xlu0 %v621_v53, %s1847_s11  ;;  %693 = vrot.lane.b32.xlu1 %v688_v0, %s1848_s12 }
  0x29   : > { %691 = vrot.lane.b32.xlu0 %v681_v61, %s1848_s12  ;;  %754 = vrot.lane.b32.xlu1 %v749_v5, %s1849_s14 }
  0x2d   : > { %752 = vrot.lane.b32.xlu0 %v741_v3, %s1849_s14  ;;  %813 = vrot.lane.b32.xlu1 %v808_v8, %s1850_s15 }
  0x31   : > { %811 = vrot.lane.b32.xlu0 %v801_v7, %s1850_s15 }
  0x7f   : > { %v454_v15 = vpop.permute.xlu1 %453 }
  0x83   : > { %v316_v11 = vpop.permute.xlu0 %315  ;;  %v392_v20 = vpop.permute.xlu1 %391 }
  0x84   : > { %325 = vst.msk [vmem:[#allocation2] sm:$0xff] %vm324_vm1, %v316_v11 }
  0x87   : > { %v318_v17 = vpop.permute.xlu0 %317  ;;  %v394_v27 = vpop.permute.xlu1 %393 }
  0x88   : > { %v320_v19 = vsel %vm319_vm2, %v316_v11, %v318_v17  ;;  %327 = vst.msk [vmem:[#allocation2 + $0x10] sm:$0xff] %vm319_vm2, %v318_v17  ;;  %v396_v29 = vsel %vm395_vm4, %v392_v20, %v394_v27 }
  0x89   : > { %v2005_v23 = vpack.c.bf16 %v320_v19, %v320_v19 }
  0x8b   : > { %v361_v22 = vld [vmem:[#allocation2] sm:$0xff]  ;;  %v452_v24 = vpop.permute.xlu0 %451  ;;  %v401_v31 = vmul.bf16 %v2005_v23, %v396_v29  ;;  %v353_v35 = vmul.bf16 %v2005_v23, %v351_v25  ;;  %v515_v40 = vpop.permute.xlu1 %514 }
  0x8c   : > { %v2008_v26 = vpack.c.bf16 %v361_v22, %v361_v22  ;;  %v456_v28 = vsel %vm455_vm3, %v452_v24, %v454_v15 }
  0x8d   : > { %v461_v38 = vmul.bf16 %v456_v28, %v2005_v23 }
  0x8e   : > { %v400_v30 = vmul.bf16 %v392_v20, %v2008_v26  ;;  %v2015_v32 = vmul.bf16 %v2008_v26, %v344_v21  ;;  %v460_v36 = vmul.bf16 %v452_v24, %v2008_v26 }
  0x8f   : > { %v363_v33 = vld [vmem:[#allocation2 + $0x10] sm:$0xff]  ;;  %v513_v34 = vpop.permute.xlu0 %512  ;;  %v574_v49 = vpop.permute.xlu1 %573 }
  0x90   : > { %v2020_v39 = vpack.c.bf16 %v363_v33, %v363_v33  ;;  %v1673_v41 = vcombine.low %v400_v30, %v401_v31  ;;  %v517_v42 = vsel %vm516_vm5, %v513_v34, %v515_v40  ;;  %v2024_v43 = vcombine.low %v2015_v32, %v353_v35 }
  0x91   : > { %v1677_v46 = vcombine.low %v460_v36, %v461_v38  ;;  %v522_v48 = vmul.bf16 %v517_v42, %v2005_v23  ;;  %v521_v52 = vmul.bf16 %v513_v34, %v2008_v26  ;;  %v1858_v35 = vmov 0   ;;  %v957_v36 = vld [vmem:[%s2268_s4] sm:$0xff] }
  0x92   : > { %v402_v44 = vmul.bf16 %v394_v27, %v2020_v39  ;;  %411 = vrot.lane.b32.xlu0 %v1673_v41, %s1851_s21  ;;  %v462_v50 = vmul.bf16 %v454_v15, %v2020_v39  ;;  %v523_v54 = vmul.bf16 %v515_v40, %v2020_v39  ;;  %v582_v0 = vmul.bf16 %v574_v49, %v2020_v39 }
  0x93   : > { %v572_v45 = vpop.permute.xlu0 %571  ;;  %v635_v57 = vpop.permute.xlu1 %634  ;;  %v1681_v59 = vcombine.low %v521_v52, %v522_v48  ;;  %940 = vmatprep.mubr.bf16.mxu0 %v1858_v35  ;;  %1794 = vset.pattern.permute.xlu0 %v1858_v35 }
  0x94   : > { %v1674_v47 = vcombine.low %v402_v44, %v402_v44  ;;  %v576_v51 = vsel %vm319_vm2, %v572_v45, %v574_v49  ;;  %v1678_v58 = vcombine.low %v462_v50, %v462_v50  ;;  %v580_v61 = vmul.bf16 %v572_v45, %v2008_v26  ;;  %1795 = vset.pattern.permute.xlu1 %v1858_v35 }
  0x95   : > { %v581_v56 = vmul.bf16 %v576_v51, %v2005_v23  ;;  %v1682_v63 = vcombine.low %v523_v54, %v523_v54  ;;  %v1686_v7 = vcombine.low %v582_v0, %v582_v0  ;;  %v643_v8 = vmul.bf16 %v635_v57, %v2020_v39  ;;  %1573 = vmatprep.mubr.bf16.mxu1 %v1858_v35 }
  0x96   : > { %413 = vrot.lane.b32.xlu1 %v1674_v47, %s1851_s21  ;;  %471 = vrot.lane.b32.xlu0 %v1677_v46, %s1852_s22 }
  0x97   : > { %v633_v53 = vpop.permute.xlu0 %632  ;;  %v694_v2 = vpop.permute.xlu1 %693  ;;  %v1685_v3 = vcombine.low %v580_v61, %v581_v56  ;;  %v1690_v17 = vcombine.low %v643_v8, %v643_v8 }
  0x98   : > { %v637_v60 = vsel %vm636_vm6, %v633_v53, %v635_v57  ;;  %v641_v5 = vmul.bf16 %v633_v53, %v2008_v26  ;;  %v702_v18 = vmul.bf16 %v694_v2, %v2020_v39 }
  0x99   : > { %v642_v1 = vmul.bf16 %v637_v60, %v2005_v23 }
  0x9a   : > { %473 = vrot.lane.b32.xlu1 %v1678_v58, %s1852_s22  ;;  %532 = vrot.lane.b32.xlu0 %v1681_v59, %s1853_s24  ;;  %v1694_v25 = vcombine.low %v702_v18, %v702_v18 }
  0x9b   : > { %v692_v62 = vpop.permute.xlu0 %691  ;;  %v755_v10 = vpop.permute.xlu1 %754  ;;  %v1689_v11 = vcombine.low %v641_v5, %v642_v1 }
  0x9c   : > { %v696_v4 = vsel %vm695_vm7, %v692_v62, %v694_v2  ;;  %v700_v15 = vmul.bf16 %v692_v62, %v2008_v26  ;;  %v763_v27 = vmul.bf16 %v755_v10, %v2020_v39 }
  0x9d   : > { %v701_v9 = vmul.bf16 %v696_v4, %v2005_v23 }
  0x9e   : > { %534 = vrot.lane.b32.xlu1 %v1682_v63, %s1853_s24  ;;  %591 = vrot.lane.b32.xlu0 %v1685_v3, %s1854_s25  ;;  %v1698_v31 = vcombine.low %v763_v27, %v763_v27 }
  0x9f   : > { %v753_v6 = vpop.permute.xlu0 %752  ;;  %v814_v20 = vpop.permute.xlu1 %813  ;;  %v1693_v21 = vcombine.low %v700_v15, %v701_v9 }
  0xa0   : > { %v757_v14 = vsel %vm756_vm8, %v753_v6, %v755_v10  ;;  %v761_v24 = vmul.bf16 %v753_v6, %v2008_v26  ;;  %v822_v33 = vmul.bf16 %v814_v20, %v2020_v39 }
  0xa1   : > { %v762_v19 = vmul.bf16 %v757_v14, %v2005_v23 }
  0xa2   : > { %593 = vrot.lane.b32.xlu1 %v1686_v7, %s1854_s25  ;;  %652 = vrot.lane.b32.xlu0 %v1689_v11, %s1855_s26 }
  0xa3   : > { %v812_v16 = vpop.permute.xlu0 %811  ;;  %v1697_v29 = vcombine.low %v761_v24, %v762_v19 }
  0xa4   : > { %v816_v22 = vsel %vm309_vm0, %v812_v16, %v814_v20  ;;  %v820_v30 = vmul.bf16 %v812_v16, %v2008_v26  ;;  %v1702_v26 = vcombine.low %v822_v33, %v822_v33 }
  0xa5   : > { %v821_v28 = vmul.bf16 %v816_v22, %v2005_v23  ;;  %v949_v23 = vld [vmem:[%s2267_s3] sm:$0xff] }
  0xa6   : > { %654 = vrot.lane.b32.xlu1 %v1690_v17, %s1855_s26  ;;  %711 = vrot.lane.b32.xlu0 %v1693_v21, %s2274_s29 }
  0xa7   : > { %v1701_v34 = vcombine.low %v820_v30, %v821_v28 }
  0xaa   : > { %713 = vrot.lane.b32.xlu1 %v1694_v25, %s2274_s29  ;;  %772 = vrot.lane.b32.xlu0 %v1697_v29, %s1857_s9 }
  0xae   : > { %774 = vrot.lane.b32.xlu1 %v1698_v31, %s1857_s9  ;;  %831 = vrot.lane.b32.xlu0 %v1701_v34, %s1859_s10 }
  0xb2   : > { %833 = vrot.lane.b32.xlu1 %v1702_v26, %s1859_s10  ;;  %952 = vperm.xlu0 %1794, %v949_v23  }
  0xb6   : > { %960 = vperm.xlu1 %1795, %v957_v36   ;;  %v842_v36 = vld [vmem:[%s2266_s2] sm:$0xf] }
 0x104   : > { %v412_v38 = vpop.permute.xlu0 %411 }
 0x105   : > { %v415_v42 = vrot.slane %v412_v38, 4 }
 0x108   : > { %v414_v39 = vpop.permute.xlu1 %413  ;;  %v472_v40 = vpop.permute.xlu0 %471 }
 0x109   : > { %v416_v41 = vrot.slane %v414_v39, 4  ;;  %v475_v51 = vrot.slane %v472_v40, 4 }
 0x10b   : > { %v418_v44 = vsel %vm417_vm9, %v415_v42, %v416_v41 }
 0x10c   : > { %v474_v45 = vpop.permute.xlu1 %473  ;;  %v420_v46 = vsel %vm419_vm10, %v412_v38, %v418_v44  ;;  %v533_v47 = vpop.permute.xlu0 %532  ;;  %v1019_v38 = vld [vmem:[%s2265_s1] sm:$0x11] }
 0x10d   : > { %v476_v48 = vrot.slane %v474_v45, 4  ;;  %v1704_v49 = vcombine.high %v2024_v43, %v420_v46  ;;  %v1766_v50 = vcombine.low %v2015_v32, %v420_v46  ;;  %v536_v57 = vrot.slane %v533_v47, 4 }
 0x10e   : > { %v1718_v39 = vcombine.low %v1019_v38, %v1019_v38 }
 0x10f   : > { %908 = vmatprep.subr.bf16.mxu0 %v1704_v49  ;;  %v477_v54 = vsel %vm417_vm9, %v475_v51, %v476_v48  ;;  %v1078_v48 = vld [vmem:[%s2265_s1] sm:$0x22] }
 0x110   : > { %v535_v52 = vpop.permute.xlu1 %534  ;;  %909 = vmatpush1.bf16.msra.mxu0 %v1766_v50  ;;  %v592_v53 = vpop.permute.xlu0 %591  ;;  %v479_v59 = vsel %vm478_vm11, %v472_v40, %v477_v54  ;;  %v1719_v40 = vcombine.high %v1019_v38, %v1019_v38  ;;  %v1026_v41 = vshrl.u32 %v1718_v39, 16  ;;  %v1135_v49 = vld [vmem:[%s2265_s1] sm:$0x22]  ;;  %v1722_v51 = vcombine.low %v1078_v48, %v1078_v48 }
 0x111   : > { %v537_v56 = vrot.slane %v535_v52, 4  ;;  %v595_v0 = vrot.slane %v592_v53, 4  ;;  %v1726_v52 = vcombine.low %v1135_v49, %v1135_v49 }
 0x112   : > { %v1034_v42 = vshrl.u32 %v1719_v40, 16  ;;  %v1027_v44 = vpack.i.b16 %v1026_v41, %v1026_v41  ;;  %v1426_v40 = vld [vmem:[%s2265_s1 + $0x8] sm:$0x11] }
 0x113   : > { %v538_v58 = vsel %vm417_vm9, %v536_v57, %v537_v56  ;;  %v1723_v56 = vcombine.high %v1078_v48, %v1078_v48  ;;  %v1727_v57 = vcombine.high %v1135_v49, %v1135_v49 }
 0x114   : > { %v540_v60 = vsel %vm2276_vm12, %v533_v47, %v538_v58  ;;  %v594_v43 = vpop.permute.xlu1 %593  ;;  %v653_v61 = vpop.permute.xlu0 %652  ;;  %vm2278_vm12 = vcmask 777216   ;;  %v1035_v45 = vpack.i.b16 %v1034_v42, %v1034_v42  ;;  %v1032_v46 = vrot.slane %v1027_v44, %v1931_v13 }
 0x115   : > { %v1705_v32 = vcombine.low %v479_v59, %v540_v60  ;;  %v1706_v62 = vcombine.high %v479_v59, %v540_v60  ;;  %v596_v63 = vrot.slane %v594_v43, 4  ;;  %v656_v5 = vrot.slane %v653_v61, 4 }
 0x116   : > { %v1040_v47 = vrot.slane %v1035_v45, %v1931_v13  ;;  %1043 = vrot.lane.b32.xlu1 %v1032_v46, %s1844_s23  ;;  %v1746_v44 = vcombine.low %v1426_v40, %v1426_v40 }
 0x117   : > { %910 = vmatprep.subr.bf16.mxu0 %v1706_v62  ;;  %v597_v3 = vsel %vm417_vm9, %v595_v0, %v596_v63  ;;  %v1085_v62 = vpack.i.b16 %v1722_v51, %v1722_v51  ;;  %v1142_v63 = vshrl.u32 %v1726_v52, 16 }
 0x118   : > { %v655_v1 = vpop.permute.xlu1 %654  ;;  %911 = vmatpush1.bf16.msra.mxu0 %v1705_v32  ;;  %v712_v2 = vpop.permute.xlu0 %711  ;;  %v599_v7 = vsel %vm598_vm13, %v592_v53, %v597_v3  ;;  %1045 = vrot.lane.b32.xlu0 %v1040_v47, %s1844_s23  ;;  %v1194_v3 = vld [vmem:[%s2265_s1] sm:$0x44]  ;;  %v1747_v47 = vcombine.high %v1426_v40, %v1426_v40  ;;  %v1433_v48 = vpack.i.b16 %v1746_v44, %v1746_v44 }
 0x119   : > { %v657_v4 = vrot.slane %v655_v1, 4  ;;  %v715_v16 = vrot.slane %v712_v2, 4  ;;  %v1092_v1 = vpack.i.b16 %v1723_v56, %v1723_v56  ;;  %v984_v56 = vld [vmem:[%s2265_s1] sm:$0x11] }
 0x11a   : > { %v1438_v51 = vrot.slane %v1433_v48, %v1931_v13 }
 0x11b   : > { %v658_v6 = vsel %vm417_vm9, %v656_v5, %v657_v4  ;;  %v1251_v4 = vld [vmem:[%s2265_s1] sm:$0x44] }
 0x11c   : > { %v660_v8 = vsel %vm2277_vm14, %v653_v61, %v658_v6  ;;  %v714_v9 = vpop.permute.xlu1 %713  ;;  %v773_v10 = vpop.permute.xlu0 %772  ;;  %vm838_vm14 = vcmask 769024  }
 0x11d   : > { %v1707_v11 = vcombine.low %v599_v7, %v660_v8  ;;  %v1708_v14 = vcombine.high %v599_v7, %v660_v8  ;;  %v716_v15 = vrot.slane %v714_v9, 4  ;;  %v776_v20 = vrot.slane %v773_v10, 4 }
 0x11e   : > { %v1090_v7 = vrot.slane %v1085_v62, %v1928_v12  ;;  %v1143_v8 = vpack.i.b16 %v1142_v63, %v1142_v63  ;;  %v1730_v9 = vcombine.low %v1194_v3, %v1194_v3 }
 0x11f   : > { %912 = vmatprep.subr.bf16.mxu0 %v1708_v14  ;;  %v717_v18 = vsel %vm417_vm9, %v715_v16, %v716_v15  ;;  %v1731_v15 = vcombine.high %v1194_v3, %v1194_v3  ;;  %v1735_v16 = vcombine.high %v1251_v4, %v1251_v4 }
 0x120   : > { %v775_v17 = vpop.permute.xlu1 %774  ;;  %913 = vmatpush1.bf16.msra.mxu0 %v1707_v11  ;;  %v832_v21 = vpop.permute.xlu0 %831  ;;  %v719_v24 = vsel %vm718_vm15, %v712_v2, %v717_v18  ;;  %v1150_v2 = vshrl.u32 %v1727_v57, 16  ;;  %v1097_v11 = vrot.slane %v1092_v1, %v1928_v12  ;;  %v1201_v18 = vpack.i.b16 %v1730_v9, %v1730_v9 }
 0x121   : > { %v777_v19 = vrot.slane %v775_v17, 4  ;;  %v835_v31 = vrot.slane %v832_v21, 4  ;;  %v1148_v17 = vrot.slane %v1143_v8, %v1928_v12  ;;  %v1715_v57 = vcombine.low %v984_v56, %v984_v56 }
 0x122   : > { %v1151_v14 = vpack.i.b16 %v1150_v2, %v1150_v2 }
 0x123   : > { %v778_v22 = vsel %vm417_vm9, %v776_v20, %v777_v19 }
 0x124   : > { %v780_v25 = vsel %vm2278_vm12, %v773_v10, %v778_v22  ;;  %v834_v27 = vpop.permute.xlu1 %833  ;;  %vm897_vm12 = vcmask 588800   ;;  %v1734_v10 = vcombine.low %v1251_v4, %v1251_v4  ;;  %v1156_v20 = vrot.slane %v1151_v14, %v1928_v12 }
 0x125   : > { %v1709_v28 = vcombine.low %v719_v24, %v780_v25  ;;  %v1710_v29 = vcombine.high %v719_v24, %v780_v25  ;;  %v836_v30 = vrot.slane %v834_v27, 4  ;;  %v1266_v22 = vshrl.u32 %v1735_v16, 16  ;;  %v1310_v24 = vld [vmem:[%s2265_s1] sm:$0x88] }
 0x126   : > { %v1258_v19 = vshrl.u32 %v1734_v10, 16  ;;  %v1367_v25 = vld [vmem:[%s2265_s1] sm:$0x88]  ;;  %v1206_v27 = vrot.slane %v1201_v18, %v1959_v37 }
 0x127   : > { %v837_v33 = vsel %vm417_vm9, %v835_v31, %v836_v30  ;;  %914 = vmatprep.subr.bf16.mxu0 %v1710_v29  ;;  %v1738_v29 = vcombine.low %v1310_v24, %v1310_v24  ;;  %v1742_v30 = vcombine.low %v1367_v25, %v1367_v25  ;;  %v1267_v31 = vpack.i.b16 %v1266_v22, %v1266_v22 }
 0x128   : > { %v839_v34 = vsel %vm838_vm14, %v832_v21, %v837_v33  ;;  %915 = vmatpush1.bf16.msra.mxu0 %v1709_v28  ;;  %v1208_v21 = vpack.i.b16 %v1731_v15, %v1731_v15  ;;  %v1259_v28 = vpack.i.b16 %v1258_v19, %v1258_v19  ;;  %v1739_v33 = vcombine.high %v1310_v24, %v1310_v24 }
 0x129   : > { %v1711_v35 = vcombine.low %v839_v34, %v839_v34  ;;  %v1712_v23 = vcombine.high %v839_v34, %v839_v34  ;;  %v1743_v34 = vcombine.high %v1367_v25, %v1367_v25 }
 0x12a   : > { %v1213_v12 = vrot.slane %v1208_v21, %v1959_v37  ;;  %v1324_v38 = vpack.i.b16 %v1739_v33, %v1739_v33 }
 0x12b   : > { %1713 = vmatprep.subr.msk.bf16.mxu0 %vm417_vm9, %v1712_v23  ;;  %v903_v26 = vsel %vm417_vm9, %v1711_v35, 0  ;;  %v1264_v35 = vrot.slane %v1259_v28, %v1959_v37  ;;  %v1317_v23 = vpack.i.b16 %v1738_v29, %v1738_v29  ;;  %v1382_v39 = vshrl.u32 %v1743_v34, 16 }
 0x12c   : > { %917 = vmatpush1.bf16.msra.mxu0 %v903_v26  ;;  %v1374_v26 = vshrl.u32 %v1742_v30, 16  ;;  %v1329_v45 = vrot.slane %v1324_v38, %v1977_v55 }
 0x12d   : > { %v1322_v41 = vrot.slane %v1317_v23, %v1977_v55  ;;  %v1383_v46 = vpack.i.b16 %v1382_v39, %v1382_v39 }
 0x12e   : > { %v1375_v42 = vpack.i.b16 %v1374_v26, %v1374_v26 }
 0x12f   : > { %1714 = vmatmul.mubr.msk.bf16.vlgmr.msra.gmra.mrb[0].mxu0 %vm897_vm12, %v842_v36  ;;  %v1272_v36 = vrot.slane %v1267_v31, %v1959_v37  ;;  %v1388_v49 = vrot.slane %v1383_v46, %v1977_v55 }
 0x130   : > { %v1380_v37 = vrot.slane %v1375_v42, %v1977_v55 }
 0x131   : > { %v953_v50 = vpop.permute.xlu0 %952 }
 0x135   : > { %v961_v54 = vpop.permute.xlu1 %960 }
 0x202   : > { %v942_v53 = vpop.f32.mrb[0].mxu0 }
 0x203   : > { %v955_v58 = vmul.f32 %v953_v50, %v942_v53  ;;  %v944_v59 = vpop.f32.mrb[1].mxu0  ;;  %v1044_v53 = vpop.permute.xlu1 %1043 }
 0x204   : > { %v956_v60 = vmul.f32 %v953_v50, %v944_v59  ;;  %v946_v43 = vpop.f32.mrb[2].mxu0  ;;  %v1440_v50 = vpack.i.b16 %v1747_v47, %v1747_v47  ;;  %v1716_v59 = vcombine.high %v984_v56, %v984_v56 }
 0x205   : > { %v963_v61 = vadd.f32 %v961_v54, %v955_v58  ;;  %v947_v32 = vpop.f32.mrb[3].mxu0 }
 0x206   : > { %v964_v0 = vadd.f32 %v961_v54, %v956_v60  ;;  %v1445_v52 = vrot.slane %v1440_v50, %v1931_v13  ;;  %v1046_v54 = vpop.permute.xlu0 %1045  ;;  %v998_v62 = vpack.i.b16 %v1716_v59, %v1716_v59 }
 0x207   : > { %v965_v5 = vmax.f32 %v963_v61, 0.0  ;;  %v991_v61 = vpack.i.b16 %v1715_v57, %v1715_v57 }
 0x208   : > { %v966_v6 = vmax.f32 %v964_v0, 0.0 }
 0x209   : > { %969 = vrot.lane.b32.xlu1 %v965_v5, %s1842_s17  ;;  %v996_v2 = vrot.slane %v991_v61, %v1931_v13 }
 0x20a   : > { %971 = vrot.lane.b32.xlu0 %v966_v6, %s1842_s17  ;;  %v1003_v6 = vrot.slane %v998_v62, %v1931_v13 }
 0x20d   : > { %1100 = vrot.lane.b32.xlu1 %v1090_v7, %s1843_s20  ;;  %v1047_v7 = vsel %vm395_vm4, %v1044_v53, %v1046_v54 }
 0x20e   : > { %1102 = vrot.lane.b32.xlu0 %v1097_v11, %s1843_s20 }
 0x211   : > { %1159 = vrot.lane.b32.xlu1 %v1148_v17, %s1846_s30 }
 0x212   : > { %1161 = vrot.lane.b32.xlu0 %v1156_v20, %s1846_s30 }
 0x215   : > { %1216 = vrot.lane.b32.xlu1 %v1206_v27, %s1842_s17 }
 0x216   : > { %1218 = vrot.lane.b32.xlu0 %v1213_v12, %s1842_s17 }
 0x219   : > { %1275 = vrot.lane.b32.xlu1 %v1264_v35, %s1847_s11 }
 0x21a   : > { %1277 = vrot.lane.b32.xlu0 %v1272_v36, %s1847_s11  ;;  %s2279_s11 = smov 96  }
 0x21d   : > { %1332 = vrot.lane.b32.xlu1 %v1322_v41, %s1848_s12 }
 0x21e   : > { %1334 = vrot.lane.b32.xlu0 %v1329_v45, %s1848_s12 }
 0x221   : > { %1391 = vrot.lane.b32.xlu1 %v1380_v37, %s1849_s14 }
 0x222   : > { %1393 = vrot.lane.b32.xlu0 %v1388_v49, %s1849_s14 }
 0x225   : > { %1448 = vrot.lane.b32.xlu1 %v1438_v51, %s1850_s15 }
 0x226   : > { %1450 = vrot.lane.b32.xlu0 %v1445_v52, %s1850_s15 }
 0x27b   : > { %v970_v55 = vpop.permute.xlu1 %969 }
 0x27c   : > { %977 = vst.msk [vmem:[#allocation2] sm:$0xff] %vm324_vm1, %v970_v55  ;;  %v972_v58 = vpop.permute.xlu0 %971  ;;  %vm2281_vm1 = vcmask 900096  }
 0x27d   : > { %v973_v60 = vsel %vm319_vm2, %v970_v55, %v972_v58  ;;  %979 = vst.msk [vmem:[#allocation2 + $0x10] sm:$0xff] %vm319_vm2, %v972_v58 }
 0x27e   : > { %v2161_v63 = vpack.c.bf16 %v973_v60, %v973_v60 }
 0x27f   : > { %v1101_v43 = vpop.permute.xlu1 %1100 }
 0x280   : > { %v1103_v32 = vpop.permute.xlu0 %1102  ;;  %v1052_v10 = vmul.bf16 %v2161_v63, %v1047_v7  ;;  %v1005_v19 = vmul.bf16 %v2161_v63, %v1003_v6 }
 0x281   : > { %v1104_v11 = vsel %vm455_vm3, %v1101_v43, %v1103_v32 }
 0x282   : > { %v1109_v21 = vmul.bf16 %v1104_v11, %v2161_v63 }
 0x283   : > { %v1072_v0 = vld [vmem:[#allocation2] sm:$0xff]  ;;  %v1160_v1 = vpop.permute.xlu1 %1159 }
 0x284   : > { %v2164_v3 = vpack.c.bf16 %v1072_v0, %v1072_v0  ;;  %v1074_v4 = vld [vmem:[#allocation2 + $0x10] sm:$0xff]  ;;  %v1162_v5 = vpop.permute.xlu0 %1161 }
 0x285   : > { %v2168_v8 = vpack.c.bf16 %v1074_v4, %v1074_v4  ;;  %v1163_v20 = vsel %vm516_vm5, %v1160_v1, %v1162_v5 }
 0x286   : > { %v1051_v9 = vmul.bf16 %v2164_v3, %v1044_v53  ;;  %v2175_v16 = vmul.bf16 %v2164_v3, %v996_v2  ;;  %v1108_v17 = vmul.bf16 %v1101_v43, %v2164_v3  ;;  %v1167_v28 = vmul.bf16 %v1160_v1, %v2164_v3 }
 0x287   : > { %v1217_v14 = vpop.permute.xlu1 %1216  ;;  %v1053_v15 = vmul.bf16 %v2168_v8, %v1046_v54  ;;  %v1110_v22 = vmul.bf16 %v1103_v32, %v2168_v8  ;;  %v1168_v29 = vmul.bf16 %v1163_v20, %v2161_v63  ;;  %v1169_v34 = vmul.bf16 %v1162_v5, %v2168_v8 }
 0x288   : > { %v1219_v18 = vpop.permute.xlu0 %1218  ;;  %v1720_v13 = vcombine.low %v1051_v9, %v1052_v10  ;;  %v2184_v25 = vcombine.low %v2175_v16, %v1005_v19  ;;  %v1724_v12 = vcombine.low %v1108_v17, %v1109_v21  ;;  %v1224_v40 = vmul.bf16 %v1217_v14, %v2164_v3 }
 0x289   : > { %v1721_v24 = vcombine.low %v1053_v15, %v1053_v15  ;;  %v1220_v31 = vsel %vm319_vm2, %v1217_v14, %v1219_v18  ;;  %v1725_v33 = vcombine.low %v1110_v22, %v1110_v22  ;;  %v1728_v36 = vcombine.low %v1167_v28, %v1168_v29 }
 0x28a   : > { %1062 = vrot.lane.b32.xlu1 %v1720_v13, %s1851_s21  ;;  %v1225_v23 = vmul.bf16 %v1220_v31, %v2161_v63  ;;  %v1729_v39 = vcombine.low %v1169_v34, %v1169_v34  ;;  %v1226_v41 = vmul.bf16 %v1219_v18, %v2168_v8  ;;  %vm2282_vm2 = vcmask 777216  }
 0x28b   : > { %v1276_v27 = vpop.permute.xlu1 %1275  ;;  %1064 = vrot.lane.b32.xlu0 %v1721_v24, %s1851_s21 }
 0x28c   : > { %v1278_v30 = vpop.permute.xlu0 %1277  ;;  %v1732_v46 = vcombine.low %v1224_v40, %v1225_v23  ;;  %v1733_v37 = vcombine.low %v1226_v41, %v1226_v41  ;;  %v1283_v48 = vmul.bf16 %v1276_v27, %v2164_v3 }
 0x28d   : > { %v1279_v38 = vsel %vm636_vm6, %v1276_v27, %v1278_v30  ;;  %v1285_v49 = vmul.bf16 %v1278_v30, %v2168_v8 }
 0x28e   : > { %1119 = vrot.lane.b32.xlu1 %v1724_v12, %s1852_s22  ;;  %v1284_v42 = vmul.bf16 %v1279_v38, %v2161_v63 }
 0x28f   : > { %v1333_v35 = vpop.permute.xlu1 %1332  ;;  %1121 = vrot.lane.b32.xlu0 %v1725_v33, %s1852_s22  ;;  %v1737_v53 = vcombine.low %v1285_v49, %v1285_v49 }
 0x290   : > { %v1335_v26 = vpop.permute.xlu0 %1334  ;;  %v1736_v51 = vcombine.low %v1283_v48, %v1284_v42  ;;  %v1340_v54 = vmul.bf16 %v1333_v35, %v2164_v3 }
 0x291   : > { %v1336_v47 = vsel %vm695_vm7, %v1333_v35, %v1335_v26  ;;  %v1342_v56 = vmul.bf16 %v1335_v26, %v2168_v8 }
 0x292   : > { %1178 = vrot.lane.b32.xlu1 %v1728_v36, %s1853_s24  ;;  %v1341_v50 = vmul.bf16 %v1336_v47, %v2161_v63 }
 0x293   : > { %v1392_v44 = vpop.permute.xlu1 %1391  ;;  %1180 = vrot.lane.b32.xlu0 %v1729_v39, %s1853_s24  ;;  %v1741_v43 = vcombine.low %v1342_v56, %v1342_v56 }
 0x294   : > { %v1394_v45 = vpop.permute.xlu0 %1393  ;;  %v1740_v59 = vcombine.low %v1340_v54, %v1341_v50  ;;  %v1399_v61 = vmul.bf16 %v1392_v44, %v2164_v3 }
 0x295   : > { %v1395_v52 = vsel %vm756_vm8, %v1392_v44, %v1394_v45  ;;  %v1401_v32 = vmul.bf16 %v1394_v45, %v2168_v8 }
 0x296   : > { %1235 = vrot.lane.b32.xlu1 %v1732_v46, %s1854_s25  ;;  %v1400_v58 = vmul.bf16 %v1395_v52, %v2161_v63 }
 0x297   : > { %1237 = vrot.lane.b32.xlu0 %v1733_v37, %s1854_s25  ;;  %v1449_v55 = vpop.permute.xlu1 %1448  ;;  %v1745_v1 = vcombine.low %v1401_v32, %v1401_v32  ;;  %s2283_s25 = sshll.u32 %s2285_s28, 4 }
 0x298   : > { %v1451_v57 = vpop.permute.xlu0 %1450  ;;  %v1744_v0 = vcombine.low %v1399_v61, %v1400_v58  ;;  %v1456_v2 = vmul.bf16 %v1449_v55, %v2164_v3  ;;  %v1590_v3 = vld [vmem:[%s2271_s7] sm:$0xff] }
 0x299   : > { %v1452_v60 = vsel %vm309_vm0, %v1449_v55, %v1451_v57  ;;  %v1458_v4 = vmul.bf16 %v1451_v57, %v2168_v8  ;;  %vm2280_vm0 = vcmask 916480  }
 0x29a   : > { %1294 = vrot.lane.b32.xlu1 %v1736_v51, %s1855_s26  ;;  %v1457_v62 = vmul.bf16 %v1452_v60, %v2161_v63  ;;  %v1582_v63 = vld [vmem:[%s2270_s6] sm:$0xff] }
 0x29b   : > { %1296 = vrot.lane.b32.xlu0 %v1737_v53, %s1855_s26  ;;  %v1749_v6 = vcombine.low %v1458_v4, %v1458_v4  ;;  %v1477_v4 = vld [vmem:[%s2269_s5] sm:$0xf] }
 0x29c   : > { %v1748_v5 = vcombine.low %v1456_v2, %v1457_v62 }
 0x29e   : > { %1351 = vrot.lane.b32.xlu1 %v1740_v59, %s2279_s11 }
 0x29f   : > { %1353 = vrot.lane.b32.xlu0 %v1741_v43, %s2279_s11 }
 0x2a2   : > { %1410 = vrot.lane.b32.xlu1 %v1744_v0, %s1857_s9 }
 0x2a3   : > { %1412 = vrot.lane.b32.xlu0 %v1745_v1, %s1857_s9 }
 0x2a6   : > { %1467 = vrot.lane.b32.xlu1 %v1748_v5, %s1859_s10 }
 0x2a7   : > { %1469 = vrot.lane.b32.xlu0 %v1749_v6, %s1859_s10  ;;  %s305_s10 = scalar_lea.vmem %s2272_s8, %s2283_s25 }
 0x2aa   : > { %1585 = vperm.xlu1 %1795, %v1582_v63  }
 0x2ab   : > { %1593 = vperm.xlu0 %1794, %v1590_v3  }
 0x2fc   : > { %v1063_v7 = vpop.permute.xlu1 %1062 }
 0x2fd   : > { %v1066_v8 = vrot.slane %v1063_v7, 4  ;;  %v1065_v9 = vpop.permute.xlu0 %1064 }
 0x2fe   : > { %v1067_v10 = vrot.slane %v1065_v9, 4 }
 0x300   : > { %v1120_v11 = vpop.permute.xlu1 %1119  ;;  %v1068_v14 = vsel %vm417_vm9, %v1066_v8, %v1067_v10 }
 0x301   : > { %v1122_v15 = vpop.permute.xlu0 %1121  ;;  %v1069_v17 = vsel %vm419_vm10, %v1063_v7, %v1068_v14  ;;  %v1123_v13 = vrot.slane %v1120_v11, 4 }
 0x302   : > { %v1124_v18 = vrot.slane %v1122_v15, 4  ;;  %v1751_v19 = vcombine.high %v2184_v25, %v1069_v17  ;;  %v1767_v20 = vcombine.low %v2175_v16, %v1069_v17  ;;  %v1832_v15 = vld [vmem:[%s1938_s16] sm:$0xff] }
 0x304   : > { %v1179_v21 = vpop.permute.xlu1 %1178  ;;  %1541 = vmatprep.subr.bf16.mxu1 %v1751_v19  ;;  %v1125_v27 = vsel %vm417_vm9, %v1123_v13, %v1124_v18  ;;  %v1833_v18 = vld [vmem:[%s1938_s16 + $0x8] sm:$0xff] }
 0x305   : > { %v1182_v22 = vrot.slane %v1179_v21, 4  ;;  %v1181_v24 = vpop.permute.xlu0 %1180  ;;  %1542 = vmatpush1.bf16.msra.mxu1 %v1767_v20  ;;  %v1126_v12 = vsel %vm478_vm11, %v1120_v11, %v1125_v27 }
 0x306   : > { %v1183_v28 = vrot.slane %v1181_v24, 4 }
 0x308   : > { %v1236_v29 = vpop.permute.xlu1 %1235  ;;  %v1184_v30 = vsel %vm417_vm9, %v1182_v22, %v1183_v28 }
 0x309   : > { %v1185_v31 = vsel %vm2280_vm0, %v1179_v21, %v1184_v30  ;;  %v1238_v33 = vpop.permute.xlu0 %1237  ;;  %v1239_v16 = vrot.slane %v1236_v29, 4 }
 0x30a   : > { %v1752_v34 = vcombine.low %v1126_v12, %v1185_v31  ;;  %v1753_v25 = vcombine.high %v1126_v12, %v1185_v31  ;;  %v1240_v35 = vrot.slane %v1238_v33, 4 }
 0x30c   : > { %v1295_v23 = vpop.permute.xlu1 %1294  ;;  %1543 = vmatprep.subr.bf16.mxu1 %v1753_v25  ;;  %v1241_v38 = vsel %vm417_vm9, %v1239_v16, %v1240_v35 }
 0x30d   : > { %v1298_v26 = vrot.slane %v1295_v23, 4  ;;  %v1297_v36 = vpop.permute.xlu0 %1296  ;;  %1544 = vmatpush1.bf16.msra.mxu1 %v1752_v34  ;;  %v1242_v42 = vsel %vm598_vm13, %v1236_v29, %v1241_v38 }
 0x30e   : > { %v1299_v39 = vrot.slane %v1297_v36, 4 }
 0x310   : > { %v1352_v40 = vpop.permute.xlu1 %1351  ;;  %v1300_v41 = vsel %vm417_vm9, %v1298_v26, %v1299_v39 }
 0x311   : > { %v1301_v44 = vsel %vm2281_vm1, %v1295_v23, %v1300_v41  ;;  %v1354_v45 = vpop.permute.xlu0 %1353  ;;  %v1355_v48 = vrot.slane %v1352_v40, 4 }
 0x312   : > { %v1754_v46 = vcombine.low %v1242_v42, %v1301_v44  ;;  %v1755_v47 = vcombine.high %v1242_v42, %v1301_v44  ;;  %v1356_v37 = vrot.slane %v1354_v45, 4 }
 0x314   : > { %v1411_v49 = vpop.permute.xlu1 %1410  ;;  %1545 = vmatprep.subr.bf16.mxu1 %v1755_v47  ;;  %v1357_v52 = vsel %vm417_vm9, %v1355_v48, %v1356_v37 }
 0x315   : > { %v1414_v50 = vrot.slane %v1411_v49, 4  ;;  %v1413_v51 = vpop.permute.xlu0 %1412  ;;  %1546 = vmatpush1.bf16.msra.mxu1 %v1754_v46  ;;  %v1358_v57 = vsel %vm718_vm15, %v1352_v40, %v1357_v52 }
 0x316   : > { %v1415_v53 = vrot.slane %v1413_v51, 4 }
 0x318   : > { %v1468_v54 = vpop.permute.xlu1 %1467  ;;  %v1416_v56 = vsel %vm417_vm9, %v1414_v50, %v1415_v53 }
 0x319   : > { %v1471_v55 = vrot.slane %v1468_v54, 4  ;;  %v1417_v58 = vsel %vm2282_vm2, %v1411_v49, %v1416_v56  ;;  %v1470_v59 = vpop.permute.xlu0 %1469 }
 0x31a   : > { %v1756_v60 = vcombine.low %v1358_v57, %v1417_v58  ;;  %v1757_v43 = vcombine.high %v1358_v57, %v1417_v58  ;;  %v1472_v61 = vrot.slane %v1470_v59, 4 }
 0x31c   : > { %v1473_v32 = vsel %vm417_vm9, %v1471_v55, %v1472_v61  ;;  %1547 = vmatprep.subr.bf16.mxu1 %v1757_v43 }
 0x31d   : > { %v1474_v62 = vsel %vm838_vm14, %v1468_v54, %v1473_v32  ;;  %1548 = vmatpush1.bf16.msra.mxu1 %v1756_v60 }
 0x31e   : > { %v1758_v0 = vcombine.low %v1474_v62, %v1474_v62  ;;  %v1759_v1 = vcombine.high %v1474_v62, %v1474_v62 }
 0x320   : > { %1760 = vmatprep.subr.msk.bf16.mxu1 %vm417_vm9, %v1759_v1  ;;  %v1536_v2 = vsel %vm417_vm9, %v1758_v0, 0 }
 0x321   : > { %1550 = vmatpush1.bf16.msra.mxu1 %v1536_v2 }
 0x324   : > { %1761 = vmatmul.mubr.msk.bf16.vlgmr.msra.gmra.mrb[0].mxu1 %vm897_vm12, %v1477_v4 }
 0x329   : > { %v1586_v5 = vpop.permute.xlu1 %1585 }
 0x32a   : > { %v1594_v7 = vpop.permute.xlu0 %1593 }
 0x3f7   : > { %v1575_v6 = vpop.f32.mrb[0].mxu1 }
 0x3f8   : > { %v1588_v63 = vmul.f32 %v1586_v5, %v1575_v6  ;;  %v1577_v3 = vpop.f32.mrb[1].mxu1 }
 0x3f9   : > { %v1589_v8 = vmul.f32 %v1586_v5, %v1577_v3  ;;  %v1579_v9 = vpop.f32.mrb[2].mxu1 }
 0x3fa   : > { %v1596_v10 = vadd.f32 %v1594_v7, %v1588_v63  ;;  %v1580_v11 = vpop.f32.mrb[3].mxu1 }
 0x3fb   : > { %v1597_v14 = vadd.f32 %v1594_v7, %v1589_v8 }
 0x3fc   : > { %v1598_v17 = vadd.f32 %v1832_v15, %v1596_v10 }
 0x3fd   : > { %v1599_v13 = vadd.f32 %v1833_v18, %v1597_v14 }
 0x3fe   : > { %v1600_v19 = vmax.f32 %v1598_v17, 0.0 }
 0x3ff   : > { %v1601_v20 = vmax.f32 %v1599_v13, 0.0 }
 0x400   : > { %1602 = vst [vmem:[%s305_s10] sm:$0xff] %v1600_v19 }
 0x401   : > { %1603 = vst [vmem:[%s305_s10 + $0x8] sm:$0xff] %v1601_v20 }
 0x402 PF: > { %s18_s27 = sadd.s32 1, %s1840_s27  }
 0x403   : > { %p15_p4 = scmp.ge.s32.totalorder %s18_s27, 4  }
 0x405   :  { %17 = sbr.rel (!%p15_p4) target bundleno = 1 (0x1), region = 82 }

</bundles_post_ra>
